<compile_context>
chip_gen: v5e
topology: v5e:2x2
jax: 0.10.0
libtpu: 0.0.40
codegen_flags: <defaults>
</compile_context>

<pallas_src>
import jax
import jax.numpy as jnp
from jax.experimental import pallas as pl
from jax.experimental.pallas import tpu as pltpu


def _round_up(x, m):
    return (x + m - 1) // m * m


# --------------------------------------------------------------------------- #
# Kernel                                                                       #
# --------------------------------------------------------------------------- #
def mnist_kernel(x_ref, w1_ref, b1_ref, w2_ref, b2_ref, w3_ref, b3_ref, o_ref):
    x = x_ref[...]                                                   # (tb, 784)

    # layer1 + ReLU (f32 MXU accumulation even when x / w1 stream as bf16)
    h1 = jnp.dot(x, w1_ref[...], preferred_element_type=jnp.float32) + b1_ref[...]
    h1 = jnp.maximum(h1, 0.0)                                        # (tb, 32)

    # layer2 + ReLU
    h2 = jnp.dot(h1, w2_ref[...], preferred_element_type=jnp.float32) + b2_ref[...]
    h2 = jnp.maximum(h2, 0.0)                                        # (tb, 32)

    # layer3 (logits)
    logits = jnp.dot(h2, w3_ref[...], preferred_element_type=jnp.float32) + b3_ref[...]

    # Numerically stable log_softmax along the last axis.  Strictly row-local,
    # so garbage rows in a ragged last batch tile never contaminate valid rows
    # (their writes are dropped by Pallas).
    m = jnp.max(logits, axis=-1, keepdims=True)
    shifted = logits - m
    lse = jnp.log(jnp.sum(jnp.exp(shifted), axis=-1, keepdims=True))
    o_ref[...] = (shifted - lse).astype(o_ref.dtype)


# --------------------------------------------------------------------------- #
# Chip-aware tile / VMEM selection                                             #
# --------------------------------------------------------------------------- #
def _tensorcore_count(kind):
    """TensorCores per device.  Prefer the Pallas HW query, fall back to name."""
    try:
        info = pltpu.get_tpu_info()
        for name in ("num_cores", "core_count", "num_tensorcores",
                     "tensorcore_count", "cores_per_chip"):
            v = getattr(info, name, None)
            if isinstance(v, int) and v > 0:
                return min(v, 2)          # at most 2 TCs per device today
    except Exception:
        pass
    # Megacore-style chips expose 2 fused TensorCores per device.
    return 2 if any(t in kind for t in ("v7", "v4", "v3")) else 1


def _chip_config():
    try:
        kind = jax.devices()[0].device_kind.lower()
    except Exception:
        kind = ""
    n_cores = _tensorcore_count(kind)
    if "v7" in kind:
        # 64 MiB physical VMEM per TC: cap f32 tiles, keep 32 MiB scoped limit.
        return dict(n_cores=max(n_cores, 2), tb=4096, tb_cap=4096, vmem=32 << 20)
    if "v6" in kind:
        return dict(n_cores=n_cores, tb=4096, tb_cap=8192, vmem=64 << 20)
    if "v5" in kind:
        return dict(n_cores=n_cores, tb=2048, tb_cap=8192, vmem=64 << 20)
    # Unknown / older chips: conservative sizing.
    return dict(n_cores=n_cores, tb=2048, tb_cap=4096, vmem=32 << 20)


def _select_batch_tile(B, gran, cfg, tb_request):
    tb = cfg["tb"] if tb_request is None else int(tb_request)
    tb = max(gran, min(tb, cfg["tb_cap"]))
    tb = min(_round_up(tb, gran), _round_up(B, gran))

    n_cores = cfg["n_cores"]
    if n_cores > 1:
        target_steps = 2 * n_cores               # >= 2 steps per TensorCore
        if B >= target_steps * gran:
            steps = max(pl.cdiv(B, tb), target_steps)
            steps = _round_up(steps, n_cores)     # even step count on v7x
            tb = max(gran, _round_up(pl.cdiv(B, steps), gran))
            # Rounding tb up can make the realised step count odd; nudge down.
            while tb > gran and pl.cdiv(B, tb) % n_cores != 0:
                tb -= gran
        elif B > gran:
            tb = max(gran, _round_up(pl.cdiv(B, n_cores), gran))
    return tb


# --------------------------------------------------------------------------- #
# Wrapper                                                                      #
# --------------------------------------------------------------------------- #
def mnist_forward(x, params, *, tb=None):
    """x: (B, 784) float32 or bfloat16.  params: transposed weights/biases (f32).

    If x arrives as bfloat16 the dominant HBM stream is halved and w1 is cast
    to bf16 once (f32 accumulation is kept); f32 x is streamed as-is — no
    wrapper-side convert pass.
    """
    B, D = x.shape
    assert D == 784
    w1, b1 = params["w1"], params["b1"]   # (784, 32), (1, 32)
    w2, b2 = params["w2"], params["b2"]   # (32, 32),  (1, 32)
    w3, b3 = params["w3"], params["b3"]   # (32, 10),  (1, 10)

    stream_bf16 = x.dtype == jnp.bfloat16
    if stream_bf16:
        w1 = w1.astype(jnp.bfloat16)      # one-off ~50 KB convert
    gran = 16 if stream_bf16 else 8       # sublane packing: bf16 packs 2 rows

    cfg = _chip_config()
    tb_eff = _select_batch_tile(B, gran, cfg, tb)
    grid = (pl.cdiv(B, tb_eff),)          # ragged last block handled by Pallas

    rep = lambda shape: pl.BlockSpec(shape, lambda i: (0, 0))  # resident weights

    out = pl.pallas_call(
        mnist_kernel,
        out_shape=jax.ShapeDtypeStruct((B, 10), jnp.float32),
        grid_spec=pltpu.PrefetchScalarGridSpec(
            num_scalar_prefetch=0,
            grid=grid,
            in_specs=[
                pl.BlockSpec((tb_eff, 784), lambda i: (i, 0)),   # x tile
                rep((784, 32)), rep((1, 32)),
                rep((32, 32)),  rep((1, 32)),
                rep((32, 10)),  rep((1, 10)),
            ],
            out_specs=pl.BlockSpec((tb_eff, 10), lambda i: (i, 0)),
        ),
        compiler_params=pltpu.CompilerParams(
            dimension_semantics=("parallel",),
            vmem_limit_bytes=cfg["vmem"],
        ),
    )(x, w1, b1, w2, b2, w3, b3)
    return out


# --------------------------------------------------------------------------- #
# Init + reference                                                             #
# --------------------------------------------------------------------------- #
def init_params(key):
    """Deterministic init matching torch.nn.Linear (stored transposed)."""
    ks = jax.random.split(key, 6)

    def linear(kw, kb, fan_in, fan_out):
        bound = 1.0 / jnp.sqrt(fan_in)
        w = jax.random.uniform(kw, (fan_in, fan_out), jnp.float32, -bound, bound)
        b = jax.random.uniform(kb, (1, fan_out), jnp.float32, -bound, bound)
        return w, b

    w1, b1 = linear(ks[0], ks[1], 784, 32)
    w2, b2 = linear(ks[2], ks[3], 32, 32)
    w3, b3 = linear(ks[4], ks[5], 32, 10)
    return {"w1": w1, "b1": b1, "w2": w2, "b2": b2, "w3": w3, "b3": b3}


def reference_forward(x, p):
    # Mirror the kernel's dtype handling: when x is bf16, w1 is quantized to
    # bf16; the math itself is done in f32 (like the MXU's f32 accumulation).
    w1 = p["w1"].astype(x.dtype).astype(jnp.float32)
    xf = x.astype(jnp.float32)
    h1 = jnp.maximum(xf @ w1 + p["b1"], 0.0)
    h2 = jnp.maximum(h1 @ p["w2"] + p["b2"], 0.0)
    logits = h2 @ p["w3"] + p["b3"]
    return jax.nn.log_softmax(logits, axis=1)


if __name__ == "__main__":
    key = jax.random.PRNGKey(0)
    kx, kp = jax.random.split(key)
    params = init_params(kp)

    # 1) small-shape correctness check (single full tile)
    B = 8
    x = jax.random.normal(kx, (B, 784), dtype=jnp.float32)
    out = jax.block_until_ready(mnist_forward(x, params))
    ref = reference_forward(x, params)
    assert out.shape == (B, 10)
    assert jnp.allclose(out, ref, atol=1e-5, rtol=1e-5)

    # 2) ragged batch, single partial block (no wrapper padding anywhere)
    B_r = 13
    x_r = jax.random.normal(kx, (B_r, 784), dtype=jnp.float32)
    out_r = jax.block_until_ready(mnist_forward(x_r, params))
    ref_r = reference_forward(x_r, params)
    assert out_r.shape == (B_r, 10)
    assert jnp.allclose(out_r, ref_r, atol=1e-5, rtol=1e-5)

    # 3) larger batch with a multi-step grid and a ragged last tile
    B2 = 2000
    x2 = jax.random.normal(kx, (B2, 784), dtype=jnp.float32)
    out2 = jax.block_until_ready(mnist_forward(x2, params, tb=768))
    ref2 = reference_forward(x2, params)
    assert out2.shape == (B2, 10)
    assert jnp.allclose(out2, ref2, atol=1e-4, rtol=1e-4)

    # 4) caller-supplied bf16 input (halved x HBM traffic), loose-tol accuracy
    x2_bf16 = x2.astype(jnp.bfloat16)
    out3 = jax.block_until_ready(mnist_forward(x2_bf16, params))
    ref3 = reference_forward(x2_bf16, params)
    assert out3.shape == (B2, 10)
    assert bool(jnp.all(jnp.isfinite(out3)))
    assert jnp.allclose(out3, ref3, atol=2e-3, rtol=2e-3)

    print("KERNEL_OK")
</pallas_src>

<mosaic_0001>
module attributes {stable_mosaic.version = 11 : i64} {
  func.func @mnist_kernel(%arg0: i32, %arg1: memref<8x784xf32, #tpu.memory_space<vmem>>, %arg2: memref<784x32xf32, #tpu.memory_space<vmem>>, %arg3: memref<1x32xf32, #tpu.memory_space<vmem>>, %arg4: memref<32x32xf32, #tpu.memory_space<vmem>>, %arg5: memref<1x32xf32, #tpu.memory_space<vmem>>, %arg6: memref<32x10xf32, #tpu.memory_space<vmem>>, %arg7: memref<1x10xf32, #tpu.memory_space<vmem>>, %arg8: memref<8x10xf32, #tpu.memory_space<vmem>>) attributes {dimension_semantics = [#tpu.dimension_semantics<parallel>], iteration_bounds = array<i64: 1>, scalar_prefetch = 0 : i64, scratch_operands = 0 : i64, tpu.core_type = #tpu.core_type<tc>, window_params = [{transform_indices = @transform_0, window_bounds = array<i64: 8, 784>}, {pipeline_mode = #tpu.pipeline_mode<synchronous>, transform_indices = @transform_1, window_bounds = array<i64: 784, 32>}, {pipeline_mode = #tpu.pipeline_mode<synchronous>, transform_indices = @transform_2, window_bounds = array<i64: 1, 32>}, {pipeline_mode = #tpu.pipeline_mode<synchronous>, transform_indices = @transform_3, window_bounds = array<i64: 32, 32>}, {pipeline_mode = #tpu.pipeline_mode<synchronous>, transform_indices = @transform_4, window_bounds = array<i64: 1, 32>}, {pipeline_mode = #tpu.pipeline_mode<synchronous>, transform_indices = @transform_5, window_bounds = array<i64: 32, 10>}, {pipeline_mode = #tpu.pipeline_mode<synchronous>, transform_indices = @transform_6, window_bounds = array<i64: 1, 10>}, {transform_indices = @transform_7, window_bounds = array<i64: 8, 10>}]} {
    %c0 = arith.constant 0 : index
    %c0_0 = arith.constant 0 : index
    %0 = vector.load %arg1[%c0, %c0_0] : memref<8x784xf32, #tpu.memory_space<vmem>>, vector<8x784xf32>
    %c0_1 = arith.constant 0 : index
    %c0_2 = arith.constant 0 : index
    %1 = vector.load %arg2[%c0_1, %c0_2] : memref<784x32xf32, #tpu.memory_space<vmem>>, vector<784x32xf32>
    %cst = arith.constant dense<0.000000e+00> : vector<8x32xf32>
    %2 = tpu.matmul %0, %1, %cst {dimension_numbers = #tpu.dot_dimension_numbers<[1], [0], [0], [1], [0, 0, 1, 1], [], []>} : vector<8x784xf32>, vector<784x32xf32>, vector<8x32xf32> -> vector<8x32xf32>
    %c0_3 = arith.constant 0 : index
    %c0_4 = arith.constant 0 : index
    %3 = vector.load %arg3[%c0_3, %c0_4] : memref<1x32xf32, #tpu.memory_space<vmem>>, vector<1x32xf32>
    %4 = vector.broadcast %3 : vector<1x32xf32> to vector<8x32xf32>
    %5 = arith.addf %2, %4 : vector<8x32xf32>
    %cst_5 = arith.constant 0.000000e+00 : f32
    %6 = vector.broadcast %cst_5 : f32 to vector<8x32xf32>
    %7 = arith.maximumf %5, %6 : vector<8x32xf32>
    %c0_6 = arith.constant 0 : index
    %c0_7 = arith.constant 0 : index
    %8 = vector.load %arg4[%c0_6, %c0_7] : memref<32x32xf32, #tpu.memory_space<vmem>>, vector<32x32xf32>
    %cst_8 = arith.constant dense<0.000000e+00> : vector<8x32xf32>
    %9 = tpu.matmul %7, %8, %cst_8 {dimension_numbers = #tpu.dot_dimension_numbers<[1], [0], [0], [1], [0, 0, 1, 1], [], []>} : vector<8x32xf32>, vector<32x32xf32>, vector<8x32xf32> -> vector<8x32xf32>
    %c0_9 = arith.constant 0 : index
    %c0_10 = arith.constant 0 : index
    %10 = vector.load %arg5[%c0_9, %c0_10] : memref<1x32xf32, #tpu.memory_space<vmem>>, vector<1x32xf32>
    %11 = vector.broadcast %10 : vector<1x32xf32> to vector<8x32xf32>
    %12 = arith.addf %9, %11 : vector<8x32xf32>
    %cst_11 = arith.constant 0.000000e+00 : f32
    %13 = vector.broadcast %cst_11 : f32 to vector<8x32xf32>
    %14 = arith.maximumf %12, %13 : vector<8x32xf32>
    %c0_12 = arith.constant 0 : index
    %c0_13 = arith.constant 0 : index
    %15 = vector.load %arg6[%c0_12, %c0_13] : memref<32x10xf32, #tpu.memory_space<vmem>>, vector<32x10xf32>
    %cst_14 = arith.constant dense<0.000000e+00> : vector<8x10xf32>
    %16 = tpu.matmul %14, %15, %cst_14 {dimension_numbers = #tpu.dot_dimension_numbers<[1], [0], [0], [1], [0, 0, 1, 1], [], []>} : vector<8x32xf32>, vector<32x10xf32>, vector<8x10xf32> -> vector<8x10xf32>
    %c0_15 = arith.constant 0 : index
    %c0_16 = arith.constant 0 : index
    %17 = vector.load %arg7[%c0_15, %c0_16] : memref<1x10xf32, #tpu.memory_space<vmem>>, vector<1x10xf32>
    %18 = vector.broadcast %17 : vector<1x10xf32> to vector<8x10xf32>
    %19 = arith.addf %16, %18 : vector<8x10xf32>
    %cst_17 = arith.constant dense<0xFF800000> : vector<8xf32>
    %20 = vector.multi_reduction <maximumf>, %19, %cst_17 [1] : vector<8x10xf32> to vector<8xf32>
    %21 = vector.shape_cast %20 : vector<8xf32> to vector<8x1xf32>
    %22 = vector.broadcast %21 : vector<8x1xf32> to vector<8x10xf32>
    %23 = arith.subf %19, %22 : vector<8x10xf32>
    %24 = math.exp %23 : vector<8x10xf32>
    %cst_18 = arith.constant dense<0.000000e+00> : vector<8xf32>
    %25 = vector.multi_reduction <add>, %24, %cst_18 [1] : vector<8x10xf32> to vector<8xf32>
    %26 = vector.shape_cast %25 : vector<8xf32> to vector<8x1xf32>
    %27 = math.log %26 : vector<8x1xf32>
    %28 = vector.broadcast %27 : vector<8x1xf32> to vector<8x10xf32>
    %29 = arith.subf %23, %28 : vector<8x10xf32>
    %c0_19 = arith.constant 0 : index
    %c0_20 = arith.constant 0 : index
    %30 = vector.load %arg8[%c0_19, %c0_20] : memref<8x10xf32, #tpu.memory_space<vmem>>, vector<8x10xf32>
    tpu.vector_store %arg8[%c0_19, %c0_20], %29 {strides = array<i32>} : memref<8x10xf32, #tpu.memory_space<vmem>>, vector<8x10xf32>,
    return
  }
  func.func @transform_0(%arg0: i32) -> (i32, i32) {
    %c0_i32 = arith.constant 0 : i32
    %c0_i32_0 = arith.constant 0 : i32
    return %arg0, %c0_i32 : i32, i32
  }
  func.func @transform_1(%arg0: i32) -> (i32, i32) {
    %c0_i32 = arith.constant 0 : i32
    %c0_i32_0 = arith.constant 0 : i32
    %c0_i32_1 = arith.constant 0 : i32
    return %c0_i32, %c0_i32_0 : i32, i32
  }
  func.func @transform_2(%arg0: i32) -> (i32, i32) {
    %c0_i32 = arith.constant 0 : i32
    %c0_i32_0 = arith.constant 0 : i32
    %c0_i32_1 = arith.constant 0 : i32
    return %c0_i32, %c0_i32_0 : i32, i32
  }
  func.func @transform_3(%arg0: i32) -> (i32, i32) {
    %c0_i32 = arith.constant 0 : i32
    %c0_i32_0 = arith.constant 0 : i32
    %c0_i32_1 = arith.constant 0 : i32
    return %c0_i32, %c0_i32_0 : i32, i32
  }
  func.func @transform_4(%arg0: i32) -> (i32, i32) {
    %c0_i32 = arith.constant 0 : i32
    %c0_i32_0 = arith.constant 0 : i32
    %c0_i32_1 = arith.constant 0 : i32
    return %c0_i32, %c0_i32_0 : i32, i32
  }
  func.func @transform_5(%arg0: i32) -> (i32, i32) {
    %c0_i32 = arith.constant 0 : i32
    %c0_i32_0 = arith.constant 0 : i32
    %c0_i32_1 = arith.constant 0 : i32
    return %c0_i32, %c0_i32_0 : i32, i32
  }
  func.func @transform_6(%arg0: i32) -> (i32, i32) {
    %c0_i32 = arith.constant 0 : i32
    %c0_i32_0 = arith.constant 0 : i32
    %c0_i32_1 = arith.constant 0 : i32
    return %c0_i32, %c0_i32_0 : i32, i32
  }
  func.func @transform_7(%arg0: i32) -> (i32, i32) {
    %c0_i32 = arith.constant 0 : i32
    %c0_i32_0 = arith.constant 0 : i32
    return %arg0, %c0_i32 : i32, i32
  }
}

</mosaic_0001>

<bundles_post_ra>
// kernel: tpu_custom_call.1
= control target key start
LH: loop header
LB: loop body
LE: loop exit
PB: predicated region body
PF: predicated region fallthrough
CT: control target
= control target key end

     0   :  { %s807_s0 = inlined_call_operand.vmem [shape: f32[8,784], index: 0, kind: input, shape index: {}]   ;;  %s808_s1 = inlined_call_operand.vmem [shape: f32[784,32], index: 1, kind: input, shape index: {}]   ;;  %s809_s2 = inlined_call_operand.vmem [shape: f32[1,32], index: 2, kind: input, shape index: {}]   ;;  %s810_s3 = inlined_call_operand.vmem [shape: f32[32,32], index: 3, kind: input, shape index: {}]   ;;  %s811_s4 = inlined_call_operand.vmem [shape: f32[1,32], index: 4, kind: input, shape index: {}]   ;;  %s812_s5 = inlined_call_operand.vmem [shape: f32[32,10], index: 5, kind: input, shape index: {}]   ;;  %s813_s6 = inlined_call_operand.vmem [shape: f32[1,10], index: 6, kind: input, shape index: {}]   ;;  %s814_s7 = inlined_call_operand.hbm [shape: f32[8,10], index: 7, kind: output, shape index: {}]  }
   0x1   :  { %v49_v0 = vld [vmem:[%s808_s1 + $0x78] sm:$0xff]  ;;  %v48_v1 = vld [vmem:[%s808_s1 + $0x70] sm:$0xff]  ;;  %v47_v4 = vld [vmem:[%s808_s1 + $0x68] sm:$0xff] }
   0x2   :  { %v65_v2 = vld [vmem:[%s808_s1 + $0xf8] sm:$0xff]  ;;  %140 = vmatpush.msra.mxu0 %v49_v0  ;;  %v64_v3 = vld [vmem:[%s808_s1 + $0xf0] sm:$0xff]  ;;  %v63_v5 = vld [vmem:[%s808_s1 + $0xe8] sm:$0xff] }
   0x3   :  { %160 = vmatpush.msra.mxu1 %v65_v2  ;;  %v46_v6 = vld [vmem:[%s808_s1 + $0x60] sm:$0xff]  ;;  %v45_v8 = vld [vmem:[%s808_s1 + $0x58] sm:$0xff]  ;;  %v44_v10 = vld [vmem:[%s808_s1 + $0x50] sm:$0xff] }
   0x4   :  { %141 = vmatpush.msra.mxu0 %v48_v1  ;;  %v62_v7 = vld [vmem:[%s808_s1 + $0xe0] sm:$0xff]  ;;  %v61_v9 = vld [vmem:[%s808_s1 + $0xd8] sm:$0xff]  ;;  %v60_v12 = vld [vmem:[%s808_s1 + $0xd0] sm:$0xff] }
   0x5   :  { %161 = vmatpush.msra.mxu1 %v64_v3  ;;  %v81_v11 = vld [vmem:[%s808_s1 + $0x178] sm:$0xff]  ;;  %v80_v13 = vld [vmem:[%s808_s1 + $0x170] sm:$0xff]  ;;  %v79_v15 = vld [vmem:[%s808_s1 + $0x168] sm:$0xff] }
   0x6   :  { %142 = vmatpush.msra.mxu0 %v47_v4  ;;  %180 = vmatpush.msra.mxu2 %v81_v11  ;;  %v97_v14 = vld [vmem:[%s808_s1 + $0x1f8] sm:$0xff]  ;;  %v96_v16 = vld [vmem:[%s808_s1 + $0x1f0] sm:$0xff]  ;;  %v43_v17 = vld [vmem:[%s808_s1 + $0x48] sm:$0xff] }
   0x7   :  { %162 = vmatpush.msra.mxu1 %v63_v5  ;;  %v59_v18 = vld [vmem:[%s808_s1 + $0xc8] sm:$0xff]  ;;  %200 = vmatpush.msra.mxu3 %v97_v14  ;;  %v78_v19 = vld [vmem:[%s808_s1 + $0x160] sm:$0xff]  ;;  %v77_v23 = vld [vmem:[%s808_s1 + $0x158] sm:$0xff] }
   0x8   :  { %143 = vmatpush.msra.mxu0 %v46_v6  ;;  %181 = vmatpush.msra.mxu2 %v80_v13  ;;  %v95_v20 = vld [vmem:[%s808_s1 + $0x1e8] sm:$0xff]  ;;  %v42_v21 = vld [vmem:[%s808_s1 + $0x40] sm:$0xff]  ;;  %v41_v25 = vld [vmem:[%s808_s1 + $0x38] sm:$0xff] }
   0x9   :  { %163 = vmatpush.msra.mxu1 %v62_v7  ;;  %v58_v22 = vld [vmem:[%s808_s1 + $0xc0] sm:$0xff]  ;;  %201 = vmatpush.msra.mxu3 %v96_v16  ;;  %v57_v26 = vld [vmem:[%s808_s1 + $0xb8] sm:$0xff]  ;;  %v76_v27 = vld [vmem:[%s808_s1 + $0x150] sm:$0xff] }
   0xa   :  { %144 = vmatpush.msra.mxu0 %v45_v8  ;;  %182 = vmatpush.msra.mxu2 %v79_v15  ;;  %v94_v24 = vld [vmem:[%s808_s1 + $0x1e0] sm:$0xff]  ;;  %v93_v28 = vld [vmem:[%s808_s1 + $0x1d8] sm:$0xff]  ;;  %v40_v29 = vld [vmem:[%s808_s1 + $0x30] sm:$0xff] }
   0xb   :  { %164 = vmatpush.msra.mxu1 %v61_v9  ;;  %202 = vmatpush.msra.mxu3 %v95_v20  ;;  %v56_v30 = vld [vmem:[%s808_s1 + $0xb0] sm:$0xff]  ;;  %v75_v31 = vld [vmem:[%s808_s1 + $0x148] sm:$0xff]  ;;  %v74_v35 = vld [vmem:[%s808_s1 + $0x140] sm:$0xff] }
   0xc   :  { %145 = vmatpush.msra.mxu0 %v44_v10  ;;  %183 = vmatpush.msra.mxu2 %v78_v19  ;;  %v92_v32 = vld [vmem:[%s808_s1 + $0x1d0] sm:$0xff]  ;;  %v39_v33 = vld [vmem:[%s808_s1 + $0x28] sm:$0xff]  ;;  %v38_v37 = vld [vmem:[%s808_s1 + $0x20] sm:$0xff] }
   0xd   :  { %165 = vmatpush.msra.mxu1 %v60_v12  ;;  %203 = vmatpush.msra.mxu3 %v94_v24  ;;  %v55_v34 = vld [vmem:[%s808_s1 + $0xa8] sm:$0xff]  ;;  %v54_v38 = vld [vmem:[%s808_s1 + $0xa0] sm:$0xff]  ;;  %v73_v39 = vld [vmem:[%s808_s1 + $0x138] sm:$0xff] }
   0xe   :  { %146 = vmatpush.msra.mxu0 %v43_v17  ;;  %184 = vmatpush.msra.mxu2 %v77_v23  ;;  %v91_v36 = vld [vmem:[%s808_s1 + $0x1c8] sm:$0xff]  ;;  %v90_v40 = vld [vmem:[%s808_s1 + $0x1c0] sm:$0xff]  ;;  %v37_v41 = vld [vmem:[%s808_s1 + $0x18] sm:$0xff] }
   0xf   :  { %166 = vmatpush.msra.mxu1 %v59_v18  ;;  %204 = vmatpush.msra.mxu3 %v93_v28  ;;  %v53_v42 = vld [vmem:[%s808_s1 + $0x98] sm:$0xff]  ;;  %v72_v43 = vld [vmem:[%s808_s1 + $0x130] sm:$0xff]  ;;  %v71_v47 = vld [vmem:[%s808_s1 + $0x128] sm:$0xff] }
  0x10   :  { %147 = vmatpush.msra.mxu0 %v42_v21  ;;  %185 = vmatpush.msra.mxu2 %v76_v27  ;;  %v89_v44 = vld [vmem:[%s808_s1 + $0x1b8] sm:$0xff]  ;;  %v36_v45 = vld [vmem:[%s808_s1 + $0x10] sm:$0xff]  ;;  %v35_v49 = vld [vmem:[%s808_s1 + $0x8] sm:$0xff] }
  0x11   :  { %167 = vmatpush.msra.mxu1 %v58_v22  ;;  %205 = vmatpush.msra.mxu3 %v92_v32  ;;  %v52_v46 = vld [vmem:[%s808_s1 + $0x90] sm:$0xff]  ;;  %v51_v50 = vld [vmem:[%s808_s1 + $0x88] sm:$0xff]  ;;  %v70_v51 = vld [vmem:[%s808_s1 + $0x120] sm:$0xff] }
  0x12   :  { %148 = vmatpush.msra.mxu0 %v41_v25  ;;  %186 = vmatpush.msra.mxu2 %v75_v31  ;;  %v88_v48 = vld [vmem:[%s808_s1 + $0x1b0] sm:$0xff]  ;;  %v87_v52 = vld [vmem:[%s808_s1 + $0x1a8] sm:$0xff]  ;;  %v34_v53 = vld [vmem:[%s808_s1] sm:$0xff] }
  0x13   :  { %168 = vmatpush.msra.mxu1 %v57_v26  ;;  %206 = vmatpush.msra.mxu3 %v91_v36  ;;  %v50_v54 = vld [vmem:[%s808_s1 + $0x80] sm:$0xff]  ;;  %v113_v55 = vld [vmem:[%s808_s1 + $0x278] sm:$0xff]  ;;  %v112_v59 = vld [vmem:[%s808_s1 + $0x270] sm:$0xff] }
  0x14   :  { %149 = vmatpush.msra.mxu0 %v40_v29  ;;  %187 = vmatpush.msra.mxu2 %v74_v35  ;;  %v129_v56 = vld [vmem:[%s808_s1 + $0x2f8] sm:$0xff]  ;;  %v86_v58 = vld [vmem:[%s808_s1 + $0x1a0] sm:$0xff]  ;;  %v128_v60 = vld [vmem:[%s808_s1 + $0x2f0] sm:$0xff] }
  0x15   :  { %169 = vmatpush.msra.mxu1 %v56_v30  ;;  %207 = vmatpush.msra.mxu3 %v90_v40  ;;  %v69_v57 = vld [vmem:[%s808_s1 + $0x118] sm:$0xff]  ;;  %v68_v61 = vld [vmem:[%s808_s1 + $0x110] sm:$0xff]  ;;  %v111_v63 = vld [vmem:[%s808_s1 + $0x268] sm:$0xff] }
  0x16   :  { %150 = vmatpush.msra.mxu0 %v39_v33  ;;  %188 = vmatpush.msra.mxu2 %v73_v39  ;;  %v85_v62 = vld [vmem:[%s808_s1 + $0x198] sm:$0xff]  ;;  %v110_v0 = vld [vmem:[%s808_s1 + $0x260] sm:$0xff]  ;;  %v127_v1 = vld [vmem:[%s808_s1 + $0x2e8] sm:$0xff] }
  0x17   :  { %170 = vmatpush.msra.mxu1 %v55_v34  ;;  %208 = vmatpush.msra.mxu3 %v89_v44  ;;  %v126_v2 = vld [vmem:[%s808_s1 + $0x2e0] sm:$0xff]  ;;  %v67_v3 = vld [vmem:[%s808_s1 + $0x108] sm:$0xff]  ;;  %v84_v4 = vld [vmem:[%s808_s1 + $0x190] sm:$0xff] }
  0x18   :  { %151 = vmatpush.msra.mxu0 %v38_v37  ;;  %189 = vmatpush.msra.mxu2 %v72_v43  ;;  %v66_v5 = vld [vmem:[%s808_s1 + $0x100] sm:$0xff]  ;;  %v83_v6 = vld [vmem:[%s808_s1 + $0x188] sm:$0xff] }
  0x19   :  { %171 = vmatpush.msra.mxu1 %v54_v38  ;;  %209 = vmatpush.msra.mxu3 %v88_v48 }
  0x1a   :  { %152 = vmatpush.msra.mxu0 %v37_v41  ;;  %190 = vmatpush.msra.mxu2 %v71_v47 }
  0x1b   :  { %172 = vmatpush.msra.mxu1 %v53_v42  ;;  %210 = vmatpush.msra.mxu3 %v87_v52 }
  0x1c   :  { %153 = vmatpush.msra.mxu0 %v36_v45  ;;  %191 = vmatpush.msra.mxu2 %v70_v51 }
  0x1d   :  { %173 = vmatpush.msra.mxu1 %v52_v46  ;;  %211 = vmatpush.msra.mxu3 %v86_v58 }
  0x1e   :  { %154 = vmatpush.msra.mxu0 %v35_v49  ;;  %192 = vmatpush.msra.mxu2 %v69_v57 }
  0x1f   :  { %174 = vmatpush.msra.mxu1 %v51_v50  ;;  %212 = vmatpush.msra.mxu3 %v85_v62 }
  0x20   :  { %155 = vmatpush.msra.mxu0 %v34_v53  ;;  %193 = vmatpush.msra.mxu2 %v68_v61 }
  0x21   :  { %175 = vmatpush.msra.mxu1 %v50_v54 }
  0x22   :  { %220 = vmatpush.msrb.mxu0 %v113_v55 }
  0x23   :  { %240 = vmatpush.msrb.mxu1 %v129_v56 }
  0x24   :  { %221 = vmatpush.msrb.mxu0 %v112_v59 }
  0x25   :  { %241 = vmatpush.msrb.mxu1 %v128_v60 }
  0x26   :  { %222 = vmatpush.msrb.mxu0 %v111_v63 }
  0x27   :  { %242 = vmatpush.msrb.mxu1 %v127_v1 }
  0x28   :  { %12 = vsyncpa [#allocation3], 0  ;;  %v109_v7 = vld [vmem:[%s808_s1 + $0x258] sm:$0xff]  ;;  %194 = vmatpush.msra.mxu2 %v67_v3  ;;  %213 = vmatpush.msra.mxu3 %v84_v4  ;;  %v29_v9 = vld [vmem:[%s807_s0 + $0x10] sm:$0xff]  ;;  %vm136_vm0 = vcmask 130048   ;;  %vm289_vm1 = vcmask 261120  }
  0x29   :  { %v125_v8 = vld [vmem:[%s808_s1 + $0x2d8] sm:$0xff]  ;;  %223 = vmatpush.msrb.mxu0 %v110_v0  ;;  %243 = vmatpush.msrb.mxu1 %v126_v2  ;;  %v82_v10 = vld [vmem:[%s808_s1 + $0x180] sm:$0xff]  ;;  %v108_v11 = vld [vmem:[%s808_s1 + $0x250] sm:$0xff]  ;;  %vm345_vm2 = vcmask 80896   ;;  %s366_s23 = sshll.u32 %s814_s7, 4  ;;  %s367_s23 = int_to_ptr.hbm [resolvable:$true] %s366_s23 }
  0x2a   :  { %v124_v12 = vld [vmem:[%s808_s1 + $0x2d0] sm:$0xff]  ;;  %195 = vmatpush.msra.mxu2 %v66_v5  ;;  %214 = vmatpush.msra.mxu3 %v83_v6  ;;  %v131_v13 = vld [vmem:[%s808_s1 + $0x308] sm:$0xff]  ;;  %v27_v14 = vld [vmem:[%s807_s0] sm:$0xff] }
  0x2b   :  { %224 = vmatpush.msrb.mxu0 %v109_v7  ;;  %244 = vmatpush.msrb.mxu1 %v125_v8  ;;  %v107_v15 = vld [vmem:[%s808_s1 + $0x248] sm:$0xff]  ;;  %v30_v17 = vld [vmem:[%s807_s0 + $0x18] sm:$0xff]  ;;  %v106_v19 = vld [vmem:[%s808_s1 + $0x240] sm:$0xff] }
  0x2c   :  { %v123_v16 = vld [vmem:[%s808_s1 + $0x2c8] sm:$0xff]  ;;  %196 = vmatmul.f32.vlgmr.msra.gmra.mxu2 %v29_v9  ;;  %215 = vmatpush.msra.mxu3 %v82_v10  ;;  %v122_v20 = vld [vmem:[%s808_s1 + $0x2c0] sm:$0xff]  ;;  %v105_v22 = vld [vmem:[%s808_s1 + $0x238] sm:$0xff] }
  0x2d   :  { %225 = vmatpush.msrb.mxu0 %v108_v11  ;;  %245 = vmatpush.msrb.mxu1 %v124_v12  ;;  %v28_v18 = vld [vmem:[%s807_s0 + $0x8] sm:$0xff]  ;;  %v130_v21 = vld [vmem:[%s808_s1 + $0x300] sm:$0xff]  ;;  %v121_v23 = vld [vmem:[%s808_s1 + $0x2b8] sm:$0xff] }
  0x2e   :  { %274 = vmatpush.msrb.mxu2 %v131_v13  ;;  %156 = vmatmul.f32.vlgmr.msra.gmra.mxu0 %v27_v14  ;;  %v33_v24 = vld [vmem:[%s807_s0 + $0x30] sm:$0xff]  ;;  %v103_v27 = vld [vmem:[%s808_s1 + $0x228] sm:$0xff]  ;;  %v102_v29 = vld [vmem:[%s808_s1 + $0x220] sm:$0xff] }
  0x2f   :  { %226 = vmatpush.msrb.mxu0 %v107_v15  ;;  %246 = vmatpush.msrb.mxu1 %v123_v16  ;;  %v104_v25 = vld [vmem:[%s808_s1 + $0x230] sm:$0xff]  ;;  %v119_v28 = vld [vmem:[%s808_s1 + $0x2a8] sm:$0xff]  ;;  %v118_v30 = vld [vmem:[%s808_s1 + $0x2a0] sm:$0xff] }
  0x30   :  { %216 = vmatmul.f32.vlgmr.msra.gmra.mxu3 %v30_v17  ;;  %176 = vmatmul.f32.vlgmr.msra.gmra.mxu1 %v28_v18  ;;  %v120_v26 = vld [vmem:[%s808_s1 + $0x2b0] sm:$0xff]  ;;  %v101_v31 = vld [vmem:[%s808_s1 + $0x218] sm:$0xff]  ;;  %v99_v35 = vld [vmem:[%s808_s1 + $0x208] sm:$0xff] }
  0x31   :  { %227 = vmatpush.msrb.mxu0 %v106_v19  ;;  %247 = vmatpush.msrb.mxu1 %v122_v20  ;;  %v117_v32 = vld [vmem:[%s808_s1 + $0x298] sm:$0xff]  ;;  %v100_v33 = vld [vmem:[%s808_s1 + $0x210] sm:$0xff]  ;;  %v115_v36 = vld [vmem:[%s808_s1 + $0x288] sm:$0xff] }
  0x32   :  { %275 = vmatpush.msrb.mxu2 %v130_v21  ;;  %v116_v34 = vld [vmem:[%s808_s1 + $0x290] sm:$0xff]  ;;  %v98_v37 = vld [vmem:[%s808_s1 + $0x200] sm:$0xff]  ;;  %v32_v40 = vld [vmem:[%s807_s0 + $0x28] sm:$0xff] }
  0x33   :  { %228 = vmatpush.msrb.mxu0 %v105_v22  ;;  %248 = vmatpush.msrb.mxu1 %v121_v23  ;;  %v114_v38 = vld [vmem:[%s808_s1 + $0x280] sm:$0xff]  ;;  %v284_v41 = vld [vmem:[%s810_s3 + $0x18] sm:$0xff]  ;;  %v283_v42 = vld [vmem:[%s810_s3 + $0x10] sm:$0xff] }
  0x34   :  { %375 = vmatmul.msk.f32.vlgmr.msrb.gmra.mxu2 %vm136_vm0, %v33_v24  ;;  %v31_v39 = vld [vmem:[%s807_s0 + $0x20] sm:$0xff]  ;;  %305 = vmatpush.msrb.mxu3 %v284_v41  ;;  %v282_v43 = vld [vmem:[%s810_s3 + $0x8] sm:$0xff]  ;;  %v317_v45 = vld [vmem:[%s812_s5 + $0x18] sm:$0xff] }
  0x35   :  { %229 = vmatpush.msrb.mxu0 %v104_v25  ;;  %249 = vmatpush.msrb.mxu1 %v120_v26  ;;  %v281_v44 = vld [vmem:[%s810_s3] sm:$0xff]  ;;  %v316_v46 = vld [vmem:[%s812_s5 + $0x10] sm:$0xff]  ;;  %v315_v63 = vld [vmem:[%s812_s5 + $0x8] sm:$0xff] }
  0x36   :  { %306 = vmatpush.msrb.mxu3 %v283_v42  ;;  %337 = vmatpush.msra.mxu2 %v317_v45  ;;  %v379_v47 = vld [vmem:[%s809_s2] ss:$0 sm:$0xff] }
  0x37   :  { %230 = vmatpush.msrb.mxu0 %v103_v27  ;;  %250 = vmatpush.msrb.mxu1 %v119_v28  ;;  %v314_v0 = vld [vmem:[%s812_s5] sm:$0xff] }
  0x38   :  { %307 = vmatpush.msrb.mxu3 %v282_v43  ;;  %338 = vmatpush.msra.mxu2 %v316_v46  ;;  %v380_v1 = vld [vmem:[%s811_s4] ss:$0 sm:$0xff]  ;;  %s412_s4 = smov [#allocation2]  }
  0x39   :  { %231 = vmatpush.msrb.mxu0 %v102_v29  ;;  %251 = vmatpush.msrb.mxu1 %v118_v30  ;;  %v381_v5 = vld [vmem:[%s813_s6] ss:$0 sm:$0xff]  ;;  %s364_s5 = sshll.u32 %s412_s4, 4  ;;  %s365_s5 = int_to_ptr.vmem [resolvable:$true] %s364_s5 }
  0x3a   :  { %308 = vmatpush.msrb.mxu3 %v281_v44  ;;  %339 = vmatpush.msra.mxu2 %v315_v63 }
  0x3b   :  { %232 = vmatpush.msrb.mxu0 %v101_v31  ;;  %252 = vmatpush.msrb.mxu1 %v117_v32 }
  0x3c   :  { %340 = vmatpush.msra.mxu2 %v314_v0 }
  0x3d   :  { %233 = vmatpush.msrb.mxu0 %v100_v33  ;;  %253 = vmatpush.msrb.mxu1 %v116_v34 }
  0x3f   :  { %234 = vmatpush.msrb.mxu0 %v99_v35  ;;  %254 = vmatpush.msrb.mxu1 %v115_v36 }
  0x41   :  { %235 = vmatpush.msrb.mxu0 %v98_v37  ;;  %255 = vmatpush.msrb.mxu1 %v114_v38 }
  0x42   :  { %236 = vmatmul.f32.vlgmr.msrb.gmra.mxu0 %v31_v39  ;;  %256 = vmatmul.f32.vlgmr.msrb.gmra.mxu1 %v32_v40 }
  0xab   :  { %v157_v48 = vpop.f32.mrf.mxu0 }
  0xac   :  { %v158_v49 = vadd.f32 %v379_v47, %v157_v48 }
  0xad   :  { %v177_v50 = vpop.f32.mrf.mxu1 }
  0xae   :  { %v178_v51 = vadd.f32 %v177_v50, %v158_v49 }
  0xaf   :  { %v197_v52 = vpop.f32.mrf.mxu2 }
  0xb0   :  { %v198_v53 = vadd.f32 %v197_v52, %v178_v51 }
  0xb3   :  { %v217_v54 = vpop.f32.mrf.mxu3 }
  0xb4   :  { %v218_v55 = vadd.f32 %v217_v54, %v198_v53 }
  0xb7   :  { %v277_v59 = vpop.f32.mrf.mxu2 }
  0xbf   :  { %v237_v56 = vpop.f32.mrf.mxu0  ;;  %v257_v57 = vpop.f32.mrf.mxu1 }
  0xc0   :  { %v238_v58 = vadd.f32 %v237_v56, %v218_v55 }
  0xc2   :  { %v258_v60 = vadd.f32 %v257_v57, %v238_v58 }
  0xc4   :  { %v278_v61 = vadd.f32 %v277_v59, %v258_v60 }
  0xc6   :  { %v280_v62 = vmax.f32 %v278_v61, 0.0 }
  0xc8   :  { %376 = vmatmul.msk.f32.vlgmr.msrb.gmra.mxu3 %vm289_vm1, %v280_v62 }
 0x14b   :  { %v310_v2 = vpop.f32.mrf.mxu3 }
 0x14c   :  { %v311_v3 = vadd.f32 %v380_v1, %v310_v2 }
 0x14e   :  { %v313_v4 = vmax.f32 %v311_v3, 0.0 }
 0x150   :  { %377 = vmatmul.msk.f32.vlgmr.msra.gmra.mxu2 %vm289_vm1, %v313_v4 }
 0x1d3   :  { %v342_v6 = vpop.f32.mrf.mxu2 }
 0x1d4   :  { %v343_v7 = vadd.f32 %v381_v5, %v342_v6 }
 0x1d6   :  { %v346_v8 = vsel %vm345_vm2, %v343_v7, -inf }
 0x1d7   :  { %347 = vmax.xlane.f32.xlu0 %v346_v8 }
 0x24a   :  { %v348_v9 = vpop.xlane.xlu0 %347 }
 0x24b   :  { %v349_v10 = vsub.f32 %v343_v7, %v348_v9 }
 0x24d   :  { %v350_v11 = vmul.f32 1.442695, %v349_v10 }
 0x24f   :  { %382 = vpow2.f32 %v350_v11 }
 0x255   :  { %v383_v12 = vpop.eup %382 }
 0x256   :  { %v352_v13 = vsel %vm345_vm2, %v383_v12, 0.0 }
 0x257   :  { %353 = vadd.xlane.f32.xlu0 %v352_v13 }
 0x2ca   :  { %v354_v14 = vpop.xlane.xlu0 %353 }
 0x2cb   :  { %384 = vlog2.f32 %v354_v14 }
 0x2d1   :  { %v385_v15 = vpop.eup %384 }
 0x2d2   :  { %v356_v16 = vmul.f32 0.6931472, %v385_v15 }
 0x2d4   :  { %v357_v17 = vsub.f32 %v349_v10, %v356_v16 }
 0x2d6   :  { %358 = vst.msk [vmem:[#allocation2] sm:$0xff] %vm345_vm2, %v357_v17 }
 0x2d7   :  { %369 = dma.vmem_to_hbm [thread:$0]  %s365_s5, 128, %s367_s23, [#allocation3]  }
 0x2d8   :  { %410 = dma.done.wait [#allocation3], 128  }
 0x2d9   :  { %411 = vsyncadd [#allocation3], 4294967168 }
 0x2da   :  { %374 = vsyncpa [#allocation3], 1 }

</bundles_post_ra>
